<compile_context>
chip_gen: v5e
topology: v5e:2x2
jax: 0.10.0
libtpu: 0.0.40
codegen_flags: <defaults>
</compile_context>

<pallas_src>
from functools import partial

import jax
import jax.numpy as jnp
from jax.experimental import pallas as pl
from jax.experimental.pallas import tpu as pltpu


# -----------------------------------------------------------------------------
# pltpu.roll convention probe (one-time, tiny).  True if pltpu.roll matches
# jnp.roll (out[i] = in[i - shift]).  Primed eagerly in __main__.
# -----------------------------------------------------------------------------
_ROLL_LIKE_JNP = None


def _roll_like_jnp() -> bool:
    global _ROLL_LIKE_JNP
    if _ROLL_LIKE_JNP is None:
        def probe(x_ref, o_ref):
            o_ref[...] = pltpu.roll(x_ref[...], 1, axis=1)

        with jax.ensure_compile_time_eval():
            x = jax.lax.broadcasted_iota(jnp.float32, (8, 128), 1)
            y = pl.pallas_call(
                probe, out_shape=jax.ShapeDtypeStruct((8, 128), jnp.float32))(x)
            _ROLL_LIKE_JNP = bool(y[0, 1] == 0.0)
    return _ROLL_LIKE_JNP


# -----------------------------------------------------------------------------
# Fused kernel.  grid = (B, K + L):
#   s <  K : accumulate conv_1x1 over Cin tiles into h scratch.
#   s >= K : dilated residual layer l = s - K (dilation 2**l); output conv at
#            the last layer step.
# -----------------------------------------------------------------------------
def _single_stage_kernel(tval_ref, x_ref, m_ref, w_in_ref, b_in_ref,
                         wd_ref, bd_ref, w1_ref, b1_ref, w_out_ref, b_out_ref,
                         o_ref, h_ref, *, k_steps, num_layers, roll_like_jnp):
    """One grid step of the fused SingleStageModel forward.

    tval_ref : (1,)        i32 SMEM   true (unpadded) sequence length T
    x_ref    : (1, ck, Tp) bf16       one Cin tile of one batch element
    m_ref    : (1, 1,  Tp) f32        mask[:, 0:1, :] (zero in padded tail)
    w_in     : (F, ck) bf16           conv_1x1 weight tile    b_in : (F, 1) f32
    wd       : (1, 3F, F) bf16        layer-l [Wl;Wm;Wr]      bd   : (1, F, 1)
    w1       : (1, F, F)  bf16        layer-l 1x1 conv        b1   : (1, F, 1)
    w_out    : (C, F) bf16            conv_out weight         b_out: (C, 1) f32
    o_ref    : (1, C, Tp) f32
    h_ref    : (F, Tp) f32 VMEM scratch carrying the activations.
    """
    s = pl.program_id(1)
    f, t_pad = h_ref.shape

    # ------------- phase 1: input 1x1 conv, streamed over Cin tiles ----------
    @pl.when(s == 0)
    def _seed_bias():
        h_ref[...] = jnp.broadcast_to(b_in_ref[...], (f, t_pad))

    @pl.when(s < k_steps)
    def _input_conv_tile():
        h_ref[...] += jnp.dot(w_in_ref[...], x_ref[0],
                              preferred_element_type=jnp.float32)

    # ------------- phase 2: one dilated residual layer per grid step ---------
    @pl.when(s >= k_steps)
    def _layer():
        l = s - k_steps
        d = jnp.left_shift(jnp.int32(1), l)          # dilation = 2**l (dynamic)
        t_valid = tval_ref[0]                        # true sequence length
        m = m_ref[0]                                 # (1, Tp) f32 frame mask
        h = h_ref[...]                               # (F, Tp) f32
        hb = h.astype(jnp.bfloat16)

        # All three conv taps in ONE MXU pass: [Wl; Wm; Wr] @ h -> (3F, Tp).
        y = jnp.dot(wd_ref[0], hb, preferred_element_type=jnp.float32)

        # Time shifts after the matmul (shift(h) @ W == shift(h @ W)), with
        # lane masks reproducing Conv1d zero padding at the true T boundary.
        t_idx = jax.lax.broadcasted_iota(jnp.int32, (1, t_pad), 1)
        d_mod = jax.lax.rem(d, jnp.int32(t_pad))
        roll_r = d_mod                                        # toward higher t
        roll_l = jax.lax.rem(jnp.int32(t_pad) - d_mod, jnp.int32(t_pad))
        if not roll_like_jnp:
            roll_r, roll_l = roll_l, roll_r
        # Left tap consumes h[t - d]: rotate right, zero where t < d.
        yl = jnp.where(t_idx >= d, pltpu.roll(y[:f], roll_r, axis=1), 0.0)
        # Right tap consumes h[t + d]: rotate left, zero where t >= T - d.
        yr = jnp.where(t_idx < t_valid - d,
                       pltpu.roll(y[2 * f:], roll_l, axis=1), 0.0)

        a = jnp.maximum(yl + y[f:2 * f] + yr + bd_ref[0], 0.0)       # ReLU
        out = jnp.dot(w1_ref[0], a.astype(jnp.bfloat16),
                      preferred_element_type=jnp.float32) + b1_ref[0]
        # TODO(synk): nn.Dropout treated as identity (eval mode).
        h_new = (h + out) * m                        # residual + frame mask
        h_ref[...] = h_new

        @pl.when(l == num_layers - 1)
        def _output_conv():
            logits = jnp.dot(w_out_ref[...], h_new.astype(jnp.bfloat16),
                             preferred_element_type=jnp.float32) + b_out_ref[...]
            o_ref[0] = (logits * m).astype(o_ref.dtype)


# -----------------------------------------------------------------------------
# VMEM budget (double-buffered blocks + scratch + per-layer f32 temporaries),
# with headroom, clamped to a v7x-safe cap.
# -----------------------------------------------------------------------------
def _vmem_limit_bytes(ck, t_pad, f, c):
    bf, f4 = 2, 4
    blocks = 2 * (ck * t_pad * bf                       # x tile
                  + t_pad * f4                          # mask row
                  + f * ck * bf + f * f4                # w_in tile + b_in
                  + 4 * f * f * bf + 2 * f * f4         # wd + w1 (+ bd + b1)
                  + c * f * bf + c * f4                 # w_out + b_out
                  + c * t_pad * f4)                     # output tile
    scratch = f * t_pad * f4                            # persistent h
    temps = 8 * f * t_pad * f4                          # y / yl / yr / a / out
    want = (blocks + scratch + temps) * 5 // 4          # ~25% headroom
    cap = 56 * 2**20                                    # safe on v7x (64 MiB/TC)
    try:
        cap = min(cap, int(pltpu.get_tpu_info().vmem_capacity_bytes) * 7 // 8)
    except Exception:
        pass
    return int(min(max(want, 32 * 2**20), cap))


# -----------------------------------------------------------------------------
# Wrapper (PyTorch NCW interface).
# -----------------------------------------------------------------------------
def single_stage_forward(params, x, mask, *, cin_tile=512):
    """x: (B, dim, T), mask: (B, num_classes, T) -> (B, num_classes, T) f32."""
    B, cin, T = x.shape
    F = params["w_in"].shape[0]
    C = params["w_out"].shape[0]
    L = params["wd"].shape[0]
    assert L >= 1

    # Lane-aligned time padding (masks inside the kernel keep outputs exact).
    Tp = max(128, ((T + 127) // 128) * 128)

    # Cin tiling for the input conv (zero-pad Cin so tiles are uniform).
    if cin <= cin_tile:
        ck, K = cin, 1
    else:
        K = pl.cdiv(cin, cin_tile)
        ck = cin_tile
    cin_p = ck * K

    x_p = jnp.pad(x.astype(jnp.bfloat16),
                  ((0, 0), (0, cin_p - cin), (0, Tp - T)))
    m_p = jnp.pad(mask[:, 0:1, :].astype(jnp.float32),
                  ((0, 0), (0, 0), (0, Tp - T)))
    w_in = params["w_in"].astype(jnp.bfloat16)
    if cin_p != cin:
        w_in = jnp.pad(w_in, ((0, 0), (0, cin_p - cin)))
    wd = params["wd"].astype(jnp.bfloat16)
    w1 = params["w1"].astype(jnp.bfloat16)
    w_out = params["w_out"].astype(jnp.bfloat16)
    b_in = params["b_in"].astype(jnp.float32)
    bd = params["bd"].astype(jnp.float32)
    b1 = params["b1"].astype(jnp.float32)
    b_out = params["b_out"].astype(jnp.float32)
    tval = jnp.asarray([T], jnp.int32)

    kernel = partial(_single_stage_kernel, k_steps=K, num_layers=L,
                     roll_like_jnp=_roll_like_jnp())

    out = pl.pallas_call(
        kernel,
        out_shape=jax.ShapeDtypeStruct((B, C, Tp), jnp.float32),
        grid=(B, K + L),
        in_specs=[
            pl.BlockSpec(memory_space=pltpu.MemorySpace.SMEM),           # T
            pl.BlockSpec((1, ck, Tp), lambda b, s: (b, jnp.minimum(s, K - 1), 0)),
            pl.BlockSpec((1, 1, Tp), lambda b, s: (b, 0, 0)),
            pl.BlockSpec((F, ck), lambda b, s: (0, jnp.minimum(s, K - 1))),
            pl.BlockSpec((F, 1), lambda b, s: (0, 0)),
            pl.BlockSpec((1, 3 * F, F), lambda b, s: (jnp.maximum(s - K, 0), 0, 0)),
            pl.BlockSpec((1, F, 1), lambda b, s: (jnp.maximum(s - K, 0), 0, 0)),
            pl.BlockSpec((1, F, F), lambda b, s: (jnp.maximum(s - K, 0), 0, 0)),
            pl.BlockSpec((1, F, 1), lambda b, s: (jnp.maximum(s - K, 0), 0, 0)),
            pl.BlockSpec((C, F), lambda b, s: (0, 0)),
            pl.BlockSpec((C, 1), lambda b, s: (0, 0)),
        ],
        out_specs=pl.BlockSpec((1, C, Tp), lambda b, s: (b, 0, 0)),
        scratch_shapes=[pltpu.VMEM((F, Tp), jnp.float32)],
        compiler_params=pltpu.CompilerParams(
            dimension_semantics=("parallel", "arbitrary"),
            vmem_limit_bytes=_vmem_limit_bytes(ck, Tp, F, C)),
    )(tval, x_p, m_p, w_in, b_in, wd, bd, w1, b1, w_out, b_out)
    return out[:, :, :T]


# -----------------------------------------------------------------------------
# Synthetic parameters (matmul weights bf16, biases f32).
# -----------------------------------------------------------------------------
def init_params(key, num_layers, num_f_maps, dim, num_classes, scale=0.1):
    ks = jax.random.split(key, 8)
    f = num_f_maps
    wd = scale * jax.random.normal(ks[2], (num_layers, 3, f, f), jnp.float32)
    return {
        "w_in": (scale * jax.random.normal(ks[0], (f, dim))).astype(jnp.bfloat16),
        "b_in": scale * jax.random.normal(ks[1], (f, 1), jnp.float32),
        "wd": wd.reshape(num_layers, 3 * f, f).astype(jnp.bfloat16),
        "bd": scale * jax.random.normal(ks[3], (num_layers, f, 1), jnp.float32),
        "w1": (scale * jax.random.normal(ks[4], (num_layers, f, f))).astype(jnp.bfloat16),
        "b1": scale * jax.random.normal(ks[5], (num_layers, f, 1), jnp.float32),
        "w_out": (scale * jax.random.normal(ks[6], (num_classes, f))).astype(jnp.bfloat16),
        "b_out": scale * jax.random.normal(ks[7], (num_classes, 1), jnp.float32),
    }


# -----------------------------------------------------------------------------
# Pure-JAX f32 reference (matches the PyTorch module in eval mode).
# -----------------------------------------------------------------------------
def reference_forward(params, x, mask):
    m = mask[:, 0:1, :].astype(jnp.float32)
    f = params["w_in"].shape[0]
    L = params["wd"].shape[0]
    T = x.shape[-1]

    def pconv(w, a):                               # (O, I) @ (B, I, T)
        return jnp.einsum("oc,bct->bot", w.astype(jnp.float32), a)

    h = pconv(params["w_in"], x.astype(jnp.float32)) + params["b_in"][None]
    for l in range(L):
        d = 2 ** l
        wd = params["wd"][l].astype(jnp.float32)
        wl, wm, wr = wd[:f], wd[f:2 * f], wd[2 * f:]
        if d < T:
            z = jnp.zeros_like(h[..., :d])
            h_left = jnp.concatenate([z, h[..., :T - d]], axis=-1)    # h[t - d]
            h_right = jnp.concatenate([h[..., d:], z], axis=-1)       # h[t + d]
        else:
            h_left = jnp.zeros_like(h)
            h_right = jnp.zeros_like(h)
        a = (jnp.einsum("oc,bct->bot", wl, h_left)
             + jnp.einsum("oc,bct->bot", wm, h)
             + jnp.einsum("oc,bct->bot", wr, h_right)
             + params["bd"][l][None])
        a = jnp.maximum(a, 0.0)
        out = pconv(params["w1"][l], a) + params["b1"][l][None]
        h = (h + out) * m
    logits = pconv(params["w_out"], h) + params["b_out"][None]
    return logits * m


if __name__ == "__main__":
    B, T = 2, 16
    dim = 24
    num_f_maps = 32
    num_classes = 8
    num_layers = 4          # dilations 1, 2, 4, 8

    key = jax.random.PRNGKey(0)
    k_par, k_x = jax.random.split(key, 2)
    params = init_params(k_par, num_layers, num_f_maps, dim, num_classes)

    x = jax.random.normal(k_x, (B, dim, T), jnp.float32)
    mask = jnp.ones((B, num_classes, T), jnp.float32)
    mask = mask.at[1, :, 12:].set(0.0)      # batch 1 "padded" after t = 12

    _roll_like_jnp()                        # prime the roll probe outside jit

    # cin_tile=16 forces the Cin-tiled input-conv path (K=2) in the small test.
    fwd = jax.jit(partial(single_stage_forward, cin_tile=16))
    out = fwd(params, x, mask)
    jax.block_until_ready(out)

    assert out.shape == (B, num_classes, T), out.shape
    assert bool(jnp.all(jnp.isfinite(out)))
    # Masked time steps must be exactly zero.
    assert bool(jnp.all(out[1, :, 12:] == 0.0))
    # Numerical parity vs f32 reference (bf16 matmuls -> loose tolerance).
    ref = reference_forward(params, x, mask)
    err = float(jnp.max(jnp.abs(out - ref)))
    assert err < 5e-2, f"max abs diff vs reference too large: {err}"

    print("KERNEL_OK")
</pallas_src>

<mosaic_0001>
module attributes {stable_mosaic.version = 11 : i64} {
  func.func @probe(%arg0: memref<8x128xf32, #tpu.memory_space<vmem>>, %arg1: memref<8x128xf32, #tpu.memory_space<vmem>>) attributes {dimension_semantics = [], scalar_prefetch = 0 : i64, scratch_operands = 0 : i64, tpu.core_type = #tpu.core_type<tc>} {
    %c0 = arith.constant 0 : index
    %c0_0 = arith.constant 0 : index
    %0 = vector.load %arg0[%c0, %c0_0] : memref<8x128xf32, #tpu.memory_space<vmem>>, vector<8x128xf32>
    %c1_i32 = arith.constant 1 : i32
    %1 = tpu.dynamic_rotate %0 by %c1_i32 dim 1 : vector<8x128xf32>, i32 -> vector<8x128xf32>
    %c0_1 = arith.constant 0 : index
    %c0_2 = arith.constant 0 : index
    %2 = vector.load %arg1[%c0_1, %c0_2] : memref<8x128xf32, #tpu.memory_space<vmem>>, vector<8x128xf32>
    tpu.vector_store %arg1[%c0_1, %c0_2], %1 {strides = array<i32>} : memref<8x128xf32, #tpu.memory_space<vmem>>, vector<8x128xf32>,
    return
  }
}

</mosaic_0001>

<bundles_post_ra>
// kernel: tpu_custom_call.1
= control target key start
LH: loop header
LB: loop body
LE: loop exit
PB: predicated region body
PF: predicated region fallthrough
CT: control target
= control target key end

     0   :  { %6 = vsyncpa [#allocation3], 0  ;;  %s118_s0 = inlined_call_operand.hbm [shape: f32[8,128], index: 0, kind: input, shape index: {}]   ;;  %s119_s1 = inlined_call_operand.hbm [shape: f32[8,128], index: 1, kind: output, shape index: {}]  }
   0x1   :  { %7 = vsyncpa [#allocation4], 0  ;;  %s13_s8 = sshll.u32 %s118_s0, 4  ;;  %s99_s9 = smov [#allocation2]   ;;  %s14_s8 = int_to_ptr.hbm [resolvable:$true] %s13_s8 }
   0x2   :  { %s15_s10 = sshll.u32 %s99_s9, 4  ;;  %s16_s10 = int_to_ptr.vmem [resolvable:$true] %s15_s10 }
   0x3   :  { %18 = dma.hbm_to_vmem [thread:$0]  %s14_s8, 128, %s16_s10, [#allocation3]  }
   0x4   :  { %95 = dma.done.wait [#allocation3], 128  }
   0x5   :  { %96 = vsyncadd [#allocation3], 4294967168  ;;  %v23_v0 = vld [vmem:[#allocation2] sm:$0xff]  ;;  %s100_s11 = smov 1   ;;  %s101_s12 = smov [#allocation5]  }
   0x6   :  { %24 = vrot.lane.b32.xlu0 %v23_v0, %s100_s11  ;;  %s32_s13 = sshll.u32 %s101_s12, 4  ;;  %s34_s16 = sshll.u32 %s119_s1, 4  ;;  %s33_s13 = int_to_ptr.vmem [resolvable:$true] %s32_s13  ;;  %s35_s16 = int_to_ptr.hbm [resolvable:$true] %s34_s16 }
  0x78   :  { %v25_v1 = vpop.permute.xlu0 %24 }
  0x79   :  { %26 = vst [vmem:[#allocation5] sm:$0xff] %v25_v1 }
  0x7a   :  { %37 = dma.vmem_to_hbm [thread:$0]  %s33_s13, 128, %s35_s16, [#allocation4]  }
  0x7b   :  { %97 = dma.done.wait [#allocation4], 128  }
  0x7c   :  { %98 = vsyncadd [#allocation4], 4294967168 }
  0x7d   :  { %42 = vsyncpa [#allocation3], 1 }
  0x7e   :  { %43 = vsyncpa [#allocation4], 1 }

</bundles_post_ra>
